<compile_context>
chip_gen: v7x
topology: tpu7x:2x2x1
jax: 0.10.0
libtpu: 0.0.40
codegen_flags: <defaults>
</compile_context>

<pallas_src>
import functools

import jax
import jax.numpy as jnp
from jax.experimental import pallas as pl
from jax.experimental.pallas import tpu as pltpu


# ------------------------------ small helpers -------------------------------

def _round_up(n: int, m: int) -> int:
    return ((n + m - 1) // m) * m


# ------------------------------ Pallas kernel -------------------------------

def _fused_mlp_kernel(*refs, n_layers: int):
    """Fused  x -> relu(xW0+b0) -> ... -> xW_{L-1}+b_{L-1}  on one batch tile.

    refs = (x_ref, w0_ref, b0_ref, ..., w_{L-1}_ref, b_{L-1}_ref, o_ref)
    All operands are VMEM-resident blocks; activations never leave VMEM/vregs.
    Accumulation and elementwise work (bias add, ReLU) stay in f32; matmul
    operands use the weights' dtype (bf16 or f32).
    """
    x_ref = refs[0]
    o_ref = refs[-1]
    wb = refs[1:-1]

    x = x_ref[...].astype(jnp.float32)
    for i in range(n_layers):
        w = wb[2 * i][...]
        b = wb[2 * i + 1][...]          # (1, dout) f32 -> broadcast over rows
        # Use HIGHEST precision only for the f32 path (exactness vs reference);
        # bf16 operands already accumulate in f32 via preferred_element_type.
        prec = jax.lax.Precision.HIGHEST if w.dtype == jnp.float32 else None
        x = jnp.dot(x.astype(w.dtype), w,
                    preferred_element_type=jnp.float32,
                    precision=prec) + b
        if i != n_layers - 1:
            x = jnp.maximum(x, 0.0)
    o_ref[...] = x.astype(o_ref.dtype)


# ----------------------------- Parameter prep -------------------------------

def prepare_qfunction_params(params, *, use_bf16: bool = True):
    """Pad/cast weights ONCE (outside the per-step forward).

    params: list of (w, b) with w: [din, dout] (transposed vs. nn.Linear),
            b: [dout] or [1, dout].
    Hidden feature dims are zero-padded to multiples of 128 (lane-dense MXU
    tiles); the first layer's input dim (= obs_dim) and last layer's output
    dim (= act_dim) stay at their true sizes so activations/outputs stream at
    true width.  Zero padding is exact: padded bias columns are 0, ReLU(0)=0,
    and padded weight rows are 0, so real outputs are unaffected.
    """
    compute_dtype = jnp.bfloat16 if use_bf16 else jnp.float32
    n_layers = len(params)
    prepared = []
    for i, (w, b) in enumerate(params):
        din, dout = w.shape
        din_p = din if i == 0 else _round_up(din, 128)
        dout_p = dout if i == n_layers - 1 else _round_up(dout, 128)
        w_p = jnp.zeros((din_p, dout_p), compute_dtype)
        w_p = w_p.at[:din, :dout].set(w.astype(compute_dtype))
        b_p = jnp.zeros((1, dout_p), jnp.float32)
        b_p = b_p.at[:, :dout].set(jnp.reshape(b, (1, -1)).astype(jnp.float32))
        prepared.append((w_p, b_p))
    return prepared


# ------------------------------ Forward wrapper ------------------------------

def qfunction_forward(prepared_params, obs):
    """Pallas implementation of QFunction.forward.

    prepared_params: output of prepare_qfunction_params (padded + cast once).
    obs:             [batch, obs_dim] float32.
    Returns          [batch, act_dim] float32.
    """
    batch, obs_dim = obs.shape
    n_layers = len(prepared_params)
    compute_dtype = prepared_params[0][0].dtype
    dins = [p[0].shape[0] for p in prepared_params]
    douts = [p[0].shape[1] for p in prepared_params]
    act_dim = douts[-1]
    assert dins[0] == obs_dim, (dins[0], obs_dim)

    # ---- batch tiling -------------------------------------------------------
    # sublane multiple: 16 for bf16 operands, 8 for f32.
    sub = 16 if compute_dtype == jnp.bfloat16 else 8
    MAX_TILE = 1024          # big tiles amortize ~0.35 us per-grid-step overhead
    SPLIT_THRESHOLD = 128    # >=2 tiles so v7x's 2nd TensorCore gets work

    pb_s = _round_up(batch, sub)
    if pb_s <= MAX_TILE:
        n_btiles = 2 if pb_s >= SPLIT_THRESHOLD else 1
    else:
        n_btiles = pl.cdiv(pb_s, MAX_TILE)
    row_tile = _round_up(pl.cdiv(pb_s, n_btiles), sub)
    pb = row_tile * n_btiles          # adaptive tile keeps padding < sub*n_btiles rows

    obs_p = obs if pb == batch else jnp.pad(obs, ((0, pb - batch), (0, 0)))

    # ---- BlockSpecs ----------------------------------------------------------
    # Activation tile streams over the batch grid at TRUE obs_dim width; weights
    # and biases map to block (0, 0) every step -> VMEM-resident, no re-DMA.
    in_specs = [pl.BlockSpec((row_tile, obs_dim), lambda bi: (bi, 0))]
    for i in range(n_layers):
        in_specs.append(pl.BlockSpec((dins[i], douts[i]), lambda bi: (0, 0)))
        in_specs.append(pl.BlockSpec((1, douts[i]), lambda bi: (0, 0)))
    # Output at TRUE act_dim width (masked sub-128-lane stores, 16x fewer bytes).
    out_specs = pl.BlockSpec((row_tile, act_dim), lambda bi: (bi, 0))

    flat_wb = [a for wb in prepared_params for a in wb]

    # ---- advisory cost estimate ---------------------------------------------
    flops = 2 * pb * sum(di * do for di, do in zip(dins, douts))
    bytes_accessed = (
        obs_p.size * obs_p.dtype.itemsize
        + sum(a.size * a.dtype.itemsize for a in flat_wb)
        + pb * act_dim * 4
    )
    cost = pl.CostEstimate(flops=flops, transcendentals=0,
                           bytes_accessed=bytes_accessed)

    kernel = functools.partial(_fused_mlp_kernel, n_layers=n_layers)

    out_p = pl.pallas_call(
        kernel,
        out_shape=jax.ShapeDtypeStruct((pb, act_dim), jnp.float32),
        grid=(n_btiles,),
        in_specs=in_specs,
        out_specs=out_specs,
        compiler_params=pltpu.CompilerParams(
            dimension_semantics=("parallel",)),
        cost_estimate=cost,
    )(obs_p, *flat_wb)

    return out_p if pb == batch else out_p[:batch]


# ----------------------------- Parameter setup ------------------------------

def init_qfunction_params(key, obs_dim, act_dim, hidden_sizes):
    """Deterministic init mimicking nn.Linear defaults (uniform(+-1/sqrt(fan_in)))."""
    sizes = [obs_dim] + list(hidden_sizes) + [act_dim]
    params = []
    for i in range(len(sizes) - 1):
        fan_in, fan_out = sizes[i], sizes[i + 1]
        key, kw, kb = jax.random.split(key, 3)
        bound = 1.0 / jnp.sqrt(jnp.float32(fan_in))
        # stored as [in, out] so the kernel computes x @ W
        w = jax.random.uniform(kw, (fan_in, fan_out), jnp.float32, -bound, bound)
        b = jax.random.uniform(kb, (1, fan_out), jnp.float32, -bound, bound)
        params.append((w, b))
    return params


# Pure-JAX reference for correctness checking (exact f32 matmul).
def qfunction_forward_ref(params, obs):
    x = obs
    n_layers = len(params)
    for i, (w, b) in enumerate(params):
        x = jnp.dot(x, w, precision=jax.lax.Precision.HIGHEST) + b
        if i != n_layers - 1:
            x = jnp.maximum(x, 0.0)
    return x


# ----------------------------------- Main ------------------------------------

if __name__ == "__main__":
    obs_dim = 32
    act_dim = 8
    hidden_sizes = [64, 64]
    batch = 2

    key = jax.random.PRNGKey(0)
    key, kobs = jax.random.split(key)
    obs = jax.random.normal(kobs, (batch, obs_dim), jnp.float32)

    params = init_qfunction_params(key, obs_dim, act_dim, hidden_sizes)

    # Padding / casting done once, outside the forward pass.
    prepared_f32 = prepare_qfunction_params(params, use_bf16=False)
    prepared_bf16 = prepare_qfunction_params(params, use_bf16=True)

    fwd = jax.jit(qfunction_forward)

    # ---- f32 path: exact vs reference ----
    out = jax.block_until_ready(fwd(prepared_f32, obs))
    ref = qfunction_forward_ref(params, obs)
    assert out.shape == (batch, act_dim), out.shape
    assert jnp.allclose(out, ref, atol=1e-5, rtol=1e-5), "f32 mismatch vs reference"

    # ---- bf16 path (default for production): looser tolerance ----
    out_bf = jax.block_until_ready(fwd(prepared_bf16, obs))
    assert jnp.allclose(out_bf, ref, atol=5e-2, rtol=5e-2), "bf16 mismatch vs reference"

    # ---- larger, non-multiple batch: exercises multi-tile grid + remainder pad ----
    key, kbig = jax.random.split(key)
    obs_big = jax.random.normal(kbig, (1000, obs_dim), jnp.float32)
    out_big = jax.block_until_ready(fwd(prepared_f32, obs_big))
    ref_big = qfunction_forward_ref(params, obs_big)
    assert out_big.shape == (1000, act_dim)
    assert jnp.allclose(out_big, ref_big, atol=1e-5, rtol=1e-5), "big-batch mismatch"

    print("KERNEL_OK")
</pallas_src>

<mosaic_0001>
module attributes {stable_mosaic.version = 11 : i64} {
  func.func @_fused_mlp_kernel(%arg0: i32, %arg1: memref<8x32xf32, #tpu.memory_space<vmem>>, %arg2: memref<32x128xf32, #tpu.memory_space<vmem>>, %arg3: memref<1x128xf32, #tpu.memory_space<vmem>>, %arg4: memref<128x128xf32, #tpu.memory_space<vmem>>, %arg5: memref<1x128xf32, #tpu.memory_space<vmem>>, %arg6: memref<128x8xf32, #tpu.memory_space<vmem>>, %arg7: memref<1x8xf32, #tpu.memory_space<vmem>>, %arg8: memref<8x8xf32, #tpu.memory_space<vmem>>) attributes {dimension_semantics = [#tpu.dimension_semantics<parallel>], iteration_bounds = array<i64: 1>, scalar_prefetch = 0 : i64, scratch_operands = 0 : i64, tpu.core_type = #tpu.core_type<tc>, window_params = [{transform_indices = @transform_0, window_bounds = array<i64: 8, 32>}, {pipeline_mode = #tpu.pipeline_mode<synchronous>, transform_indices = @transform_1, window_bounds = array<i64: 32, 128>}, {pipeline_mode = #tpu.pipeline_mode<synchronous>, transform_indices = @transform_2, window_bounds = array<i64: 1, 128>}, {pipeline_mode = #tpu.pipeline_mode<synchronous>, transform_indices = @transform_3, window_bounds = array<i64: 128, 128>}, {pipeline_mode = #tpu.pipeline_mode<synchronous>, transform_indices = @transform_4, window_bounds = array<i64: 1, 128>}, {pipeline_mode = #tpu.pipeline_mode<synchronous>, transform_indices = @transform_5, window_bounds = array<i64: 128, 8>}, {pipeline_mode = #tpu.pipeline_mode<synchronous>, transform_indices = @transform_6, window_bounds = array<i64: 1, 8>}, {transform_indices = @transform_7, window_bounds = array<i64: 8, 8>}]} {
    %c0 = arith.constant 0 : index
    %c0_0 = arith.constant 0 : index
    %0 = vector.load %arg1[%c0, %c0_0] : memref<8x32xf32, #tpu.memory_space<vmem>>, vector<8x32xf32>
    %c0_1 = arith.constant 0 : index
    %c0_2 = arith.constant 0 : index
    %1 = vector.load %arg2[%c0_1, %c0_2] : memref<32x128xf32, #tpu.memory_space<vmem>>, vector<32x128xf32>
    %c0_3 = arith.constant 0 : index
    %c0_4 = arith.constant 0 : index
    %2 = vector.load %arg3[%c0_3, %c0_4] : memref<1x128xf32, #tpu.memory_space<vmem>>, vector<1x128xf32>
    %cst = arith.constant dense<0.000000e+00> : vector<8x128xf32>
    %3 = tpu.matmul %0, %1, %cst {dimension_numbers = #tpu.dot_dimension_numbers<[1], [0], [0], [1], [0, 0, 1, 1], [], []>, precision = #tpu.contract_precision<fp32>} : vector<8x32xf32>, vector<32x128xf32>, vector<8x128xf32> -> vector<8x128xf32>
    %4 = vector.broadcast %2 : vector<1x128xf32> to vector<8x128xf32>
    %5 = arith.addf %3, %4 : vector<8x128xf32>
    %cst_5 = arith.constant 0.000000e+00 : f32
    %6 = vector.broadcast %cst_5 : f32 to vector<8x128xf32>
    %7 = arith.maximumf %5, %6 : vector<8x128xf32>
    %c0_6 = arith.constant 0 : index
    %c0_7 = arith.constant 0 : index
    %8 = vector.load %arg4[%c0_6, %c0_7] : memref<128x128xf32, #tpu.memory_space<vmem>>, vector<128x128xf32>
    %c0_8 = arith.constant 0 : index
    %c0_9 = arith.constant 0 : index
    %9 = vector.load %arg5[%c0_8, %c0_9] : memref<1x128xf32, #tpu.memory_space<vmem>>, vector<1x128xf32>
    %cst_10 = arith.constant dense<0.000000e+00> : vector<8x128xf32>
    %10 = tpu.matmul %7, %8, %cst_10 {dimension_numbers = #tpu.dot_dimension_numbers<[1], [0], [0], [1], [0, 0, 1, 1], [], []>, precision = #tpu.contract_precision<fp32>} : vector<8x128xf32>, vector<128x128xf32>, vector<8x128xf32> -> vector<8x128xf32>
    %11 = vector.broadcast %9 : vector<1x128xf32> to vector<8x128xf32>
    %12 = arith.addf %10, %11 : vector<8x128xf32>
    %cst_11 = arith.constant 0.000000e+00 : f32
    %13 = vector.broadcast %cst_11 : f32 to vector<8x128xf32>
    %14 = arith.maximumf %12, %13 : vector<8x128xf32>
    %c0_12 = arith.constant 0 : index
    %c0_13 = arith.constant 0 : index
    %15 = vector.load %arg6[%c0_12, %c0_13] : memref<128x8xf32, #tpu.memory_space<vmem>>, vector<128x8xf32>
    %c0_14 = arith.constant 0 : index
    %c0_15 = arith.constant 0 : index
    %16 = vector.load %arg7[%c0_14, %c0_15] : memref<1x8xf32, #tpu.memory_space<vmem>>, vector<1x8xf32>
    %cst_16 = arith.constant dense<0.000000e+00> : vector<8x8xf32>
    %17 = tpu.matmul %14, %15, %cst_16 {dimension_numbers = #tpu.dot_dimension_numbers<[1], [0], [0], [1], [0, 0, 1, 1], [], []>, precision = #tpu.contract_precision<fp32>} : vector<8x128xf32>, vector<128x8xf32>, vector<8x8xf32> -> vector<8x8xf32>
    %18 = vector.broadcast %16 : vector<1x8xf32> to vector<8x8xf32>
    %19 = arith.addf %17, %18 : vector<8x8xf32>
    %c0_17 = arith.constant 0 : index
    %c0_18 = arith.constant 0 : index
    %20 = vector.load %arg8[%c0_17, %c0_18] : memref<8x8xf32, #tpu.memory_space<vmem>>, vector<8x8xf32>
    tpu.vector_store %arg8[%c0_17, %c0_18], %19 {strides = array<i32>} : memref<8x8xf32, #tpu.memory_space<vmem>>, vector<8x8xf32>,
    return
  }
  func.func @transform_0(%arg0: i32) -> (i32, i32) {
    %c0_i32 = arith.constant 0 : i32
    %c0_i32_0 = arith.constant 0 : i32
    return %arg0, %c0_i32 : i32, i32
  }
  func.func @transform_1(%arg0: i32) -> (i32, i32) {
    %c0_i32 = arith.constant 0 : i32
    %c0_i32_0 = arith.constant 0 : i32
    %c0_i32_1 = arith.constant 0 : i32
    return %c0_i32, %c0_i32_0 : i32, i32
  }
  func.func @transform_2(%arg0: i32) -> (i32, i32) {
    %c0_i32 = arith.constant 0 : i32
    %c0_i32_0 = arith.constant 0 : i32
    %c0_i32_1 = arith.constant 0 : i32
    return %c0_i32, %c0_i32_0 : i32, i32
  }
  func.func @transform_3(%arg0: i32) -> (i32, i32) {
    %c0_i32 = arith.constant 0 : i32
    %c0_i32_0 = arith.constant 0 : i32
    %c0_i32_1 = arith.constant 0 : i32
    return %c0_i32, %c0_i32_0 : i32, i32
  }
  func.func @transform_4(%arg0: i32) -> (i32, i32) {
    %c0_i32 = arith.constant 0 : i32
    %c0_i32_0 = arith.constant 0 : i32
    %c0_i32_1 = arith.constant 0 : i32
    return %c0_i32, %c0_i32_0 : i32, i32
  }
  func.func @transform_5(%arg0: i32) -> (i32, i32) {
    %c0_i32 = arith.constant 0 : i32
    %c0_i32_0 = arith.constant 0 : i32
    %c0_i32_1 = arith.constant 0 : i32
    return %c0_i32, %c0_i32_0 : i32, i32
  }
  func.func @transform_6(%arg0: i32) -> (i32, i32) {
    %c0_i32 = arith.constant 0 : i32
    %c0_i32_0 = arith.constant 0 : i32
    %c0_i32_1 = arith.constant 0 : i32
    return %c0_i32, %c0_i32_0 : i32, i32
  }
  func.func @transform_7(%arg0: i32) -> (i32, i32) {
    %c0_i32 = arith.constant 0 : i32
    %c0_i32_0 = arith.constant 0 : i32
    return %arg0, %c0_i32 : i32, i32
  }
}

</mosaic_0001>

<bundles_post_ra>
// kernel: qfunction_forward.1
= control target key start
LH: loop header
LB: loop body
LE: loop exit
PB: predicated region body
PF: predicated region fallthrough
CT: control target
= control target key end

     0   :  { %12 = vsyncpa [#allocation3], 0  ;;  %s2987_s24 = smov [#allocation2]   ;;  %s3819_s0 = inlined_call_operand.vmem [shape: f32[8,32], index: 0, kind: input, shape index: {}]   ;;  %s3820_s1 = inlined_call_operand.hbm [shape: f32[32,128], index: 1, kind: input, shape index: {}]   ;;  %s3821_s2 = inlined_call_operand.vmem [shape: f32[1,128], index: 2, kind: input, shape index: {}]   ;;  %s3822_s3 = inlined_call_operand.vmem [shape: f32[128,128], index: 3, kind: input, shape index: {}]   ;;  %s3823_s4 = inlined_call_operand.vmem [shape: f32[1,128], index: 4, kind: input, shape index: {}]   ;;  %s3824_s5 = inlined_call_operand.vmem [shape: f32[128,8], index: 5, kind: input, shape index: {}]   ;;  %s3825_s6 = inlined_call_operand.vmem [shape: f32[1,8], index: 6, kind: input, shape index: {}]   ;;  %s3826_s7 = inlined_call_operand.vmem [shape: f32[8,8], index: 7, kind: output, shape index: {}]  }
   0x1   :  { %s20_s25 = sshll.u32 %s2987_s24, 4  ;;  %s2963_s28 = scalar_lea.hbm %s3820_s1, 512  ;;  %s21_s25 = int_to_ptr.vmem [resolvable:$true] %s20_s25 }
   0x2   :  { %p2964_p0 = scmp.ne.s32.totalorder %s3820_s1, %s2963_s28  ;;  %p2967_p1 = scmp.lt.u32.totalorder %s2963_s28, %s3820_s1 }
   0x4   :  { %p2969_p2 = pnand %p2967_p1, %p2964_p0 }
   0x6   :  { %2972 = shalt.err (!%p2969_p2)
}
   0x7   :  { %s2973_s10 = scalar_lea.vmem %s21_s25, 512  ;;  %p2978_p4 = scmp.lt.s32.totalorder %s21_s25, %s21_s25 }
   0x8   :  { %p2974_p3 = scmp.ne.s32.totalorder %s21_s25, %s2973_s10  ;;  %p2979_p5 = scmp.lt.s32.totalorder %s2973_s10, %s2973_s10 }
   0xa   :  { %p2980_p6 = por %p2979_p5, %p2978_p4 }
   0xc   :  { %p2981_p7 = pnand %p2980_p6, %p2974_p3 }
   0xe   :  { %2984 = shalt.err (!%p2981_p7)
}
   0xf   :  { %s2988_s11 = smov 128   ;;  %s2989_s12 = smov 8  }
  0x10   :  { %26 = dma.hbm_to_vmem [thread:$0]  %s3820_s1, 512, %s21_s25, [#allocation3], %s2988_s11, %s2988_s11, %s2989_s12  }
  0x11   :  { %2985 = dma.done.wait [#allocation3], 512  }
  0x12   :  { %2986 = vsyncadd [#allocation3], 4294966784  ;;  %v2990_v0 = vmov 0.0|0.0   ;;  %vm2991_vm0 = vmmov 0   ;;  %v3850_v1 = vmov 0.0   ;;  %vm52_vm1 = vcmask 261120  }
  0x13   :  { %2601 = vmatprep.subr.bf16.mxu0 %v2990_v0  ;;  %2123 = vmatprep.mubr.msk.f32.mxu0 %vm2991_vm0, %v3850_v1  ;;  %v41_v2 = vld [vmem:[#allocation2] sm:$0xff]  ;;  %v42_v3 = vld [vmem:[#allocation2 + $0x8] sm:$0xff]  ;;  %v43_v4 = vld [vmem:[#allocation2 + $0x10] sm:$0xff]  ;;  %vm1871_vm2 = vcmask 64512  }
  0x14   :  { %2637 = vmatprep.subr.bf16.mxu1 %v2990_v0  ;;  %2213 = vmatprep.mubr.msk.f32.mxu1 %vm2991_vm0, %v3850_v1  ;;  %v57_v5 = vand.u32 4294901760, %v41_v2  ;;  %v60_v6 = vand.u32 4294901760, %v42_v3  ;;  %v44_v7 = vld [vmem:[#allocation2 + $0x18] sm:$0xff]  ;;  %v63_v8 = vand.u32 4294901760, %v43_v4  ;;  %v40_v9 = vld [vmem:[%s3819_s0] sm:$0xff]  ;;  %v543_v13 = vld [vmem:[%s3822_s3 + $0x8] sm:$0xff] }
  0x15   :  { %v542_v10 = vld [vmem:[%s3822_s3] sm:$0xff]  ;;  %v66_v11 = vand.u32 4294901760, %v44_v7  ;;  %v54_v12 = vsel %vm52_vm1, %v40_v9, 0  ;;  %v569_v21 = vand.u32 4294901760, %v543_v13  ;;  %v544_v32 = vld [vmem:[%s3822_s3 + $0x10] sm:$0xff]  ;;  %v545_v33 = vld [vmem:[%s3822_s3 + $0x18] sm:$0xff] }
  0x16   :  { %v566_v14 = vand.u32 4294901760, %v542_v10  ;;  %v3060_v15 = vpack.c.bf16 %v60_v6, %v57_v5  ;;  %v3062_v16 = vsub.f32 %v41_v2, %v57_v5  ;;  %v3064_v17 = vsub.f32 %v42_v3, %v60_v6  ;;  %v546_v37 = vld [vmem:[%s3822_s3 + $0x20] sm:$0xff]  ;;  %v547_v38 = vld [vmem:[%s3822_s3 + $0x28] sm:$0xff]  ;;  %v548_v42 = vld [vmem:[%s3822_s3 + $0x30] sm:$0xff] }
  0x17   :  { %v3066_v18 = vsub.f32 %v43_v4, %v63_v8  ;;  %v3068_v19 = vsub.f32 %v44_v7, %v66_v11  ;;  %v3070_v20 = vand.u32 4294901760, %v54_v12  ;;  %v3073_v22 = vpack.c.bf16 %v66_v11, %v63_v8  ;;  %v549_v51 = vld [vmem:[%s3822_s3 + $0x38] sm:$0xff]  ;;  %v550_v56 = vld [vmem:[%s3822_s3 + $0x40] sm:$0xff]  ;;  %v551_v57 = vld [vmem:[%s3822_s3 + $0x48] sm:$0xff] }
  0x18   :  { %2603 = vmatpush3.bf16.msra.mxu0 %v3060_v15  ;;  %v138_v23 = vand.u32 4294901760, %v3062_v16  ;;  %v145_v24 = vand.u32 4294901760, %v3064_v17  ;;  %v3083_v28 = vpack.c.bf16 %v569_v21, %v566_v14  ;;  %v3105_v36 = vsub.f32 %v542_v10, %v566_v14  ;;  %v552_v14 = vld [vmem:[%s3822_s3 + $0x50] sm:$0xff] }
  0x19   :  { %v152_v25 = vand.u32 4294901760, %v3066_v18  ;;  %2604 = vmatprep.subr.bf16.mxu0 %v2990_v0  ;;  %v3080_v26 = vsub.f32 %v54_v12, %v3070_v20  ;;  %v159_v27 = vand.u32 4294901760, %v3068_v19  ;;  %v3114_v41 = vsub.f32 %v543_v13, %v569_v21 }
  0x1a   :  { %v139_v29 = vsub.f32 %v3062_v16, %v138_v23  ;;  %v146_v30 = vsub.f32 %v3064_v17, %v145_v24  ;;  %2639 = vmatpush3.bf16.msra.mxu1 %v3083_v28  ;;  %v572_v45 = vand.u32 4294901760, %v544_v32  ;;  %v575_v46 = vand.u32 4294901760, %v545_v33 }
  0x1b   :  { %v153_v31 = vsub.f32 %v3066_v18, %v152_v25  ;;  %v127_v34 = vand.u32 4294901760, %v3080_v26  ;;  %v160_v35 = vsub.f32 %v3068_v19, %v159_v27  ;;  %2640 = vmatprep.subr.bf16.mxu1 %v2990_v0  ;;  %v578_v49 = vand.u32 4294901760, %v546_v37 }
  0x1c   :  { %2606 = vmatpush3.bf16.msra.mxu0 %v3073_v22  ;;  %v140_v39 = vand.u32 4294901760, %v139_v29  ;;  %v147_v40 = vand.u32 4294901760, %v146_v30  ;;  %v581_v50 = vand.u32 4294901760, %v547_v38  ;;  %v3127_v53 = vpack.c.bf16 %v575_v46, %v572_v45 }
  0x1d   :  { %v128_v43 = vsub.f32 %v3080_v26, %v127_v34  ;;  %2607 = vmatprep.subr.bf16.mxu0 %v2990_v0  ;;  %v154_v44 = vand.u32 4294901760, %v153_v31  ;;  %v161_v48 = vand.u32 4294901760, %v160_v35  ;;  %v3129_v54 = vsub.f32 %v544_v32, %v572_v45 }
  0x1e   :  { %v2608_v47 = vpack.c.bf16 %v147_v40, %v140_v39  ;;  %v584_v55 = vand.u32 4294901760, %v548_v42  ;;  %v3137_v58 = vsub.f32 %v545_v33, %v575_v46  ;;  %v3139_v59 = vsub.f32 %v546_v37, %v578_v49  ;;  %2642 = vmatpush3.bf16.msra.mxu1 %v3127_v53 }
  0x1f   :  { %v129_v52 = vand.u32 4294901760, %v128_v43  ;;  %v3141_v60 = vsub.f32 %v547_v38, %v581_v50  ;;  %v3144_v61 = vpack.c.bf16 %v581_v50, %v578_v49  ;;  %v587_v62 = vand.u32 4294901760, %v549_v51  ;;  %2643 = vmatprep.subr.bf16.mxu1 %v2990_v0 }
  0x20   :  { %v3146_v63 = vsub.f32 %v548_v42, %v584_v55  ;;  %v2611_v2 = vpack.c.bf16 %v161_v48, %v154_v44  ;;  %v590_v3 = vand.u32 4294901760, %v550_v56  ;;  %v593_v4 = vand.u32 4294901760, %v551_v57 }
  0x21   :  { %2124 = vmatmul.mubr.f32.vlgmr.msra.gmra.mrb[0].mxu0 %v129_v52  ;;  %v3152_v5 = vsub.f32 %v549_v51, %v587_v62  ;;  %v3159_v8 = vpack.c.bf16 %v587_v62, %v584_v55  ;;  %v2614_v9 = vpack.c.bf16 %v3064_v17, %v3062_v16  ;;  %v2617_v11 = vpack.c.bf16 %v3068_v19, %v3066_v18  ;;  %v554_v19 = vld [vmem:[%s3822_s3 + $0x60] sm:$0xff] }
  0x22   :  { %2609 = vmatpush3.bf16.msra.mxu0 %v2608_v47  ;;  %2134 = vmatprep.mubr.msk.f32.mxu0 %vm2991_vm0, %v3850_v1  ;;  %v3154_v6 = vsub.f32 %v550_v56, %v590_v3  ;;  %v3156_v7 = vsub.f32 %v551_v57, %v593_v4  ;;  %v3167_v10 = vpack.c.bf16 %v593_v4, %v590_v3  ;;  %v596_v16 = vand.u32 4294901760, %v552_v14 }
  0x23   :  { %2610 = vmatprep.subr.bf16.mxu0 %v2990_v0  ;;  %2645 = vmatpush3.bf16.msra.mxu1 %v3144_v61  ;;  %v2626_v12 = vpack.c.bf16 %v145_v24, %v138_v23  ;;  %v2629_v13 = vpack.c.bf16 %v159_v27, %v152_v25  ;;  %v602_v21 = vand.u32 4294901760, %v554_v19  ;;  %v556_v24 = vld [vmem:[%s3822_s3 + $0x70] sm:$0xff]  ;;  %v557_v25 = vld [vmem:[%s3822_s3 + $0x78] sm:$0xff]  ;;  %v3849_v33 = vand.u32 4294901760, %v3105_v36 }
  0x24   :  { %2646 = vmatprep.subr.bf16.mxu1 %v2990_v0  ;;  %v608_v31 = vand.u32 4294901760, %v556_v24  ;;  %v611_v32 = vand.u32 4294901760, %v557_v25  ;;  %v3840_v43 = vand.u32 4294901760, %v3129_v54  ;;  %v3839_v44 = vand.u32 4294901760, %v3137_v58 }
  0x25   :  { %v3238_v29 = vsub.f32 %v554_v19, %v602_v21  ;;  %v660_v39 = vsub.f32 %v3105_v36, %v3849_v33  ;;  %v3838_v51 = vand.u32 4294901760, %v3139_v59  ;;  %v3837_v52 = vand.u32 4294901760, %v3141_v60  ;;  %v3446_v33 = vld [vmem:[%s3824_s5 + $0x50] sm:$0xff] }
  0x26   :  { %2612 = vmatpush3.bf16.msra.mxu0 %v2611_v2  ;;  %v3245_v35 = vpack.c.bf16 %v611_v32, %v608_v31  ;;  %v3247_v37 = vsub.f32 %v556_v24, %v608_v31  ;;  %v3249_v38 = vsub.f32 %v557_v25, %v611_v32  ;;  %v674_v46 = vsub.f32 %v3129_v54, %v3840_v43 }
  0x27   :  { %2613 = vmatprep.subr.bf16.mxu0 %v2990_v0  ;;  %2648 = vmatpush3.bf16.msra.mxu1 %v3159_v8  ;;  %v661_v42 = vand.u32 4294901760, %v660_v39  ;;  %v681_v47 = vsub.f32 %v3137_v58, %v3839_v44  ;;  %v688_v56 = vsub.f32 %v3139_v59, %v3838_v51  ;;  %v695_v57 = vsub.f32 %v3141_v60, %v3837_v52 }
  0x28   :  { %2649 = vmatprep.subr.bf16.mxu1 %v2990_v0  ;;  %v675_v49 = vand.u32 4294901760, %v674_v46  ;;  %v3836_v3 = vand.u32 4294901760, %v3146_v63  ;;  %v3835_v4 = vand.u32 4294901760, %v3152_v5 }
  0x29   :  { %2135 = vmatmul.mubr.f32.vlgmr.msra.gmra.mrb[0].mxu0 %v3070_v20  ;;  %v682_v50 = vand.u32 4294901760, %v681_v47  ;;  %v689_v62 = vand.u32 4294901760, %v688_v56  ;;  %v696_v2 = vand.u32 4294901760, %v695_v57 }
  0x2a   :  { %2615 = vmatpush3.bf16.msra.mxu0 %v2614_v9  ;;  %2145 = vmatprep.mubr.msk.f32.mxu0 %vm2991_vm0, %v3850_v1 }
  0x2b   :  { %2616 = vmatprep.subr.bf16.mxu0 %v2990_v0  ;;  %2651 = vmatpush3.bf16.msra.mxu1 %v3167_v10  ;;  %v2665_v55 = vpack.c.bf16 %v682_v50, %v675_v49  ;;  %v2668_v9 = vpack.c.bf16 %v696_v2, %v689_v62  ;;  %v3828_v62 = vand.u32 4294901760, %v3247_v37  ;;  %v3827_v2 = vand.u32 4294901760, %v3249_v38 }
  0x2c   :  { %2652 = vmatprep.subr.bf16.mxu1 %v2990_v0 }
  0x2e   :  { %2618 = vmatpush3.bf16.msra.mxu0 %v2617_v11  ;;  %v702_v11 = vsub.f32 %v3146_v63, %v3836_v3 }
  0x2f   :  { %2619 = vmatprep.subr.bf16.mxu0 %v2990_v0 }
  0x31   :  { %2146 = vmatmul.mubr.f32.vlgmr.msra.gmra.mrb[0].mxu0 %v3080_v26  ;;  %v3233_v26 = vsub.f32 %v552_v14, %v596_v16 }
  0x32   :  { %2621 = vmatpush3.bf16.msra.mxu0 %v3060_v15  ;;  %2156 = vmatprep.mubr.msk.f32.mxu0 %vm2991_vm0, %v3850_v1 }
  0x33   :  { %2622 = vmatprep.subr.bf16.mxu0 %v2990_v0  ;;  %v3832_v24 = vand.u32 4294901760, %v3233_v26 }
  0x35   :  { %v730_v32 = vsub.f32 %v3233_v26, %v3832_v24 }
  0x36   :  { %2624 = vmatpush3.bf16.msra.mxu0 %v3073_v22 }
  0x37   :  { %2625 = vmatprep.subr.bf16.mxu0 %v2990_v0 }
  0x39   :  { %2157 = vmatmul.mubr.f32.vlgmr.msra.gmra.mrb[0].mxu0 %v127_v34  ;;  %v3848_v34 = vand.u32 4294901760, %v3114_v41 }
  0x3a   :  { %2627 = vmatpush3.bf16.msra.mxu0 %v2626_v12  ;;  %2167 = vmatprep.mubr.msk.f32.mxu0 %vm2991_vm0, %v3850_v1  ;;  %v709_v12 = vsub.f32 %v3152_v5, %v3835_v4 }
  0x3b   :  { %2628 = vmatprep.subr.bf16.mxu0 %v2990_v0  ;;  %v667_v40 = vsub.f32 %v3114_v41, %v3848_v34 }
  0x3c   :  { %v710_v14 = vand.u32 4294901760, %v709_v12  ;;  %v758_v12 = vsub.f32 %v3247_v37, %v3828_v62 }
  0x3d   :  { %v668_v45 = vand.u32 4294901760, %v667_v40  ;;  %v731_v40 = vand.u32 4294901760, %v730_v32  ;;  %v2692_v32 = vpack.c.bf16 %v3141_v60, %v3139_v59 }
  0x3e   :  { %2630 = vmatpush3.bf16.msra.mxu0 %v2629_v13  ;;  %v703_v13 = vand.u32 4294901760, %v702_v11 }
  0x3f   :  { %2631 = vmatprep.subr.bf16.mxu0 %v2990_v0  ;;  %v3267_v48 = vpack.c.bf16 %v668_v45, %v661_v42  ;;  %v3830_v45 = vand.u32 4294901760, %v3238_v29 }
  0x41   :  { %2168 = vmatmul.mubr.f32.vlgmr.msra.gmra.mrb[0].mxu0 %v3070_v20  ;;  %v744_v49 = vsub.f32 %v3238_v29, %v3830_v45 }
  0x42   :  { %2633 = vmatpush3.bf16.msra.mxu0 %v3060_v15  ;;  %2178 = vmatprep.mubr.msk.f32.mxu0 %vm2991_vm0, %v3850_v1  ;;  %v553_v15 = vld [vmem:[%s3822_s3 + $0x58] sm:$0xff] }
  0x43   :  { %2634 = vmatprep.subr.bf16.mxu0 %v2990_v0  ;;  %v599_v17 = vand.u32 4294901760, %v553_v15  ;;  %v745_v56 = vand.u32 4294901760, %v744_v49 }
  0x45   :  { %v3215_v18 = vpack.c.bf16 %v599_v17, %v596_v16  ;;  %v3235_v27 = vsub.f32 %v553_v15, %v599_v17  ;;  %v3834_v15 = vand.u32 4294901760, %v3154_v6  ;;  %v3833_v16 = vand.u32 4294901760, %v3156_v7 }
  0x46   :  { %2636 = vmatpush3.bf16.msra.mxu0 %v3073_v22  ;;  %v2671_v17 = vpack.c.bf16 %v710_v14, %v703_v13  ;;  %v765_v13 = vsub.f32 %v3249_v38, %v3827_v2  ;;  %v759_v14 = vand.u32 4294901760, %v758_v12 }
  0x47   :  { %2805 = vmatprep.subr.bf16.mxu0 %v2990_v0  ;;  %2654 = vmatpush3.bf16.msra.mxu1 %v3215_v18  ;;  %v716_v19 = vsub.f32 %v3154_v6, %v3834_v15  ;;  %v3831_v25 = vand.u32 4294901760, %v3235_v27 }
  0x48   :  { %2655 = vmatprep.subr.bf16.mxu1 %v2990_v0 }
  0x49   :  { %2179 = vmatmul.mubr.f32.vlgmr.msra.gmra.mrb[0].mxu0 %v3070_v20  ;;  %v555_v20 = vld [vmem:[%s3822_s3 + $0x68] sm:$0xff]  ;;  %v737_v39 = vsub.f32 %v3235_v27, %v3831_v25 }
  0x4a   :  { %2458 = vmatprep.mubr.msk.f32.mxu0 %vm2991_vm0, %v3850_v1  ;;  %v605_v22 = vand.u32 4294901760, %v555_v20 }
  0x4b   :  { %v738_v42 = vand.u32 4294901760, %v737_v39  ;;  %v2695_v39 = vpack.c.bf16 %v3152_v5, %v3146_v63 }
  0x4c   :  { %v3225_v23 = vpack.c.bf16 %v605_v22, %v602_v21  ;;  %v3240_v30 = vsub.f32 %v555_v20, %v605_v22  ;;  %v723_v20 = vsub.f32 %v3156_v7, %v3833_v16  ;;  %v717_v21 = vand.u32 4294901760, %v716_v19 }
  0x4d   :  { %v2677_v47 = vpack.c.bf16 %v738_v42, %v731_v40  ;;  %v766_v19 = vand.u32 4294901760, %v765_v13  ;;  %v2698_v40 = vpack.c.bf16 %v3156_v7, %v3154_v6 }
  0x4e   :  { %2657 = vmatpush3.bf16.msra.mxu1 %v3225_v23  ;;  %v724_v22 = vand.u32 4294901760, %v723_v20  ;;  %v3829_v46 = vand.u32 4294901760, %v3240_v30 }
  0x4f   :  { %2658 = vmatprep.subr.bf16.mxu1 %v2990_v0  ;;  %v2683_v20 = vpack.c.bf16 %v766_v19, %v759_v14 }
  0x50   :  { %v2674_v31 = vpack.c.bf16 %v724_v22, %v717_v21  ;;  %v751_v50 = vsub.f32 %v3240_v30, %v3829_v46  ;;  %v2686_v21 = vpack.c.bf16 %v3114_v41, %v3105_v36  ;;  %v2689_v22 = vpack.c.bf16 %v3137_v58, %v3129_v54 }
  0x52   :  { %2660 = vmatpush3.bf16.msra.mxu1 %v3245_v35  ;;  %v752_v57 = vand.u32 4294901760, %v751_v50 }
  0x53   :  { %2661 = vmatprep.subr.bf16.mxu1 %v2990_v0 }
  0x54   :  { %v2680_v11 = vpack.c.bf16 %v752_v57, %v745_v56  ;;  %v1878_v56 = vld [vmem:[%s3821_s2] ss:$0 sm:$0xff] }
 0x11c   :  { %v537_v57 = vpop.f32.mrb[0].mxu0 }
 0x11d   :  { %v2925_v12 = vadd.f32 %v1878_v56, %v537_v57  ;;  %v2180_v13 = vpop.f32.mrb[1].mxu0  ;;  %v1213_v57 = vld [vmem:[%s3824_s5 + $0x30] sm:$0xff] }
 0x11e   :  { %v1249_v3 = vand.u32 4294901760, %v1213_v57 }
 0x11f   :  { %v541_v14 = vmax.f32 %v2925_v12, 0.0  ;;  %v1214_v12 = vld [vmem:[%s3824_s5 + $0x38] sm:$0xff] }
 0x121   :  { %v3336_v19 = vand.u32 4294901760, %v541_v14 }
 0x123   :  { %v3339_v2 = vsub.f32 %v541_v14, %v3336_v19 }
 0x125   :  { %v3845_v62 = vand.u32 4294901760, %v3339_v2 }
 0x127   :  { %v649_v46 = vsub.f32 %v3339_v2, %v3845_v62 }
 0x129   :  { %v650_v45 = vand.u32 4294901760, %v649_v46 }
 0x12b   :  { %2214 = vmatmul.mubr.f32.vlgmr.msra.gmra.mrb[0].mxu1 %v650_v45  ;;  %v1210_v45 = vld [vmem:[%s3824_s5 + $0x18] sm:$0xff] }
 0x12c   :  { %2663 = vmatpush3.bf16.msra.mxu1 %v3267_v48  ;;  %2248 = vmatprep.mubr.msk.f32.mxu1 %vm2991_vm0, %v3850_v1  ;;  %v1207_v48 = vld [vmem:[%s3824_s5] sm:$0xff] }
 0x12d   :  { %2664 = vmatprep.subr.bf16.mxu1 %v2990_v0 }
 0x130   :  { %2666 = vmatpush3.bf16.msra.mxu1 %v2665_v55  ;;  %v1208_v55 = vld [vmem:[%s3824_s5 + $0x8] sm:$0xff] }
 0x131   :  { %2667 = vmatprep.subr.bf16.mxu1 %v2990_v0 }
 0x134   :  { %2669 = vmatpush3.bf16.msra.mxu1 %v2668_v9  ;;  %v1209_v9 = vld [vmem:[%s3824_s5 + $0x10] sm:$0xff] }
 0x135   :  { %2670 = vmatprep.subr.bf16.mxu1 %v2990_v0  ;;  %v1237_v46 = vand.u32 4294901760, %v1209_v9 }
 0x137   :  { %v3388_v25 = vsub.f32 %v1209_v9, %v1237_v46 }
 0x138   :  { %2672 = vmatpush3.bf16.msra.mxu1 %v2671_v17  ;;  %v1231_v17 = vand.u32 4294901760, %v1207_v48 }
 0x139   :  { %2673 = vmatprep.subr.bf16.mxu1 %v2990_v0 }
 0x13a   :  { %v3384_v13 = vsub.f32 %v1207_v48, %v1231_v17  ;;  %v3843_v48 = vand.u32 4294901760, %v3388_v25 }
 0x13c   :  { %2675 = vmatpush3.bf16.msra.mxu1 %v2674_v31  ;;  %v1234_v31 = vand.u32 4294901760, %v1208_v55  ;;  %v3841_v52 = vand.u32 4294901760, %v3384_v13 }
 0x13d   :  { %2676 = vmatprep.subr.bf16.mxu1 %v2990_v0 }
 0x13e   :  { %v3386_v14 = vsub.f32 %v1208_v55, %v1234_v31  ;;  %v3390_v24 = vpack.c.bf16 %v1234_v31, %v1231_v17  ;;  %v1252_v55 = vand.u32 4294901760, %v1214_v12 }
 0x140   :  { %2678 = vmatpush3.bf16.msra.mxu1 %v2677_v47  ;;  %v1211_v47 = vld [vmem:[%s3824_s5 + $0x20] sm:$0xff]  ;;  %v3842_v51 = vand.u32 4294901760, %v3386_v14  ;;  %v3416_v44 = vsub.f32 %v1214_v12, %v1252_v55 }
 0x141   :  { %2679 = vmatprep.subr.bf16.mxu1 %v2990_v0 }
 0x144   :  { %2681 = vmatpush3.bf16.msra.mxu1 %v2680_v11  ;;  %v1212_v11 = vld [vmem:[%s3824_s5 + $0x28] sm:$0xff] }
 0x145   :  { %2682 = vmatprep.subr.bf16.mxu1 %v2990_v0  ;;  %v1246_v56 = vand.u32 4294901760, %v1212_v11 }
 0x147   :  { %v3396_v4 = vsub.f32 %v1212_v11, %v1246_v56  ;;  %v1339_v11 = vsub.f32 %v3388_v25, %v3843_v48  ;;  %v3431_v48 = vld [vmem:[%s3824_s5 + $0x40] sm:$0xff] }
 0x148   :  { %2684 = vmatpush3.bf16.msra.mxu1 %v2683_v20  ;;  %v1240_v20 = vand.u32 4294901760, %v1210_v45 }
 0x149   :  { %2685 = vmatprep.subr.bf16.mxu1 %v2990_v0  ;;  %v3847_v31 = vand.u32 4294901760, %v3396_v4  ;;  %v1340_v62 = vand.u32 4294901760, %v1339_v11  ;;  %v3454_v11 = vld [vmem:[%s3824_s5 + $0x58] sm:$0xff] }
 0x14a   :  { %v3392_v16 = vsub.f32 %v1210_v45, %v1240_v20  ;;  %v3405_v45 = vsub.f32 %v1213_v57, %v1249_v3 }
 0x14b   :  { %2249 = vmatmul.mubr.f32.vlgmr.msra.gmra.mrb[0].mxu1 %v3336_v19 }
 0x14c   :  { %2687 = vmatpush3.bf16.msra.mxu1 %v2686_v21  ;;  %2283 = vmatprep.mubr.msk.f32.mxu1 %vm2991_vm0, %v3850_v1  ;;  %v1243_v21 = vand.u32 4294901760, %v1211_v47  ;;  %v3844_v9 = vand.u32 4294901760, %v3392_v16 }
 0x14d   :  { %2688 = vmatprep.subr.bf16.mxu1 %v2990_v0 }
 0x14e   :  { %v3394_v15 = vsub.f32 %v1211_v47, %v1243_v21  ;;  %v1332_v47 = vsub.f32 %v3386_v14, %v3842_v51  ;;  %v1346_v43 = vsub.f32 %v3392_v16, %v3844_v9  ;;  %v3853_v51 = vand.u32 4294901760, %v3405_v45 }
 0x150   :  { %2690 = vmatpush3.bf16.msra.mxu1 %v2689_v22  ;;  %v3846_v17 = vand.u32 4294901760, %v3394_v15  ;;  %v1325_v22 = vsub.f32 %v3384_v13, %v3841_v52  ;;  %v1360_v52 = vsub.f32 %v3396_v4, %v3847_v31  ;;  %v1333_v9 = vand.u32 4294901760, %v1332_v47  ;;  %v3440_v31 = vld [vmem:[%s3824_s5 + $0x48] sm:$0xff] }
 0x151   :  { %2691 = vmatprep.subr.bf16.mxu1 %v2990_v0  ;;  %v1347_v34 = vand.u32 4294901760, %v1346_v43  ;;  %v3855_v47 = vand.u32 4294901760, %v3431_v48  ;;  %v1367_v43 = vsub.f32 %v3405_v45, %v3853_v51 }
 0x152   :  { %v1353_v57 = vsub.f32 %v3394_v15, %v3846_v17  ;;  %v1326_v12 = vand.u32 4294901760, %v1325_v22  ;;  %v3852_v17 = vand.u32 4294901760, %v3416_v44  ;;  %v3448_v22 = vpack.c.bf16 %v1240_v20, %v1237_v46 }
 0x153   :  { %v1361_v50 = vand.u32 4294901760, %v1360_v52  ;;  %v2809_v46 = vpack.c.bf16 %v1347_v34, %v1340_v62  ;;  %v3469_v52 = vsub.f32 %v3431_v48, %v3855_v47  ;;  %v3471_v20 = vpack.c.bf16 %v1246_v56, %v1243_v21  ;;  %v3487_v62 = vld [vmem:[%s3824_s5 + $0x60] sm:$0xff] }
 0x154   :  { %2693 = vmatpush3.bf16.msra.mxu1 %v2692_v32  ;;  %v2806_v1 = vpack.c.bf16 %v1333_v9, %v1326_v12  ;;  %v1354_v32 = vand.u32 4294901760, %v1353_v57  ;;  %v1374_v49 = vsub.f32 %v3416_v44, %v3852_v17  ;;  %v3854_v9 = vand.u32 4294901760, %v3440_v31 }
 0x155   :  { %2694 = vmatprep.subr.bf16.mxu1 %v2990_v0  ;;  %v3856_v57 = vand.u32 4294901760, %v3446_v33  ;;  %v3482_v34 = vpack.c.bf16 %v1252_v55, %v1249_v3  ;;  %v3858_v21 = vand.u32 4294901760, %v3469_v52  ;;  %v3860_v3 = vand.u32 4294901760, %v3487_v62 }
 0x156   :  { %2807 = vmatpush3.bf16.msra.mxu0 %v2806_v1  ;;  %v3479_v12 = vsub.f32 %v3440_v31, %v3854_v9  ;;  %v3857_v1 = vand.u32 4294901760, %v3454_v11  ;;  %v2812_v55 = vpack.c.bf16 %v1361_v50, %v1354_v32  ;;  %v1368_v47 = vand.u32 4294901760, %v1367_v43 }
 0x157   :  { %2808 = vmatprep.subr.bf16.mxu0 %v2990_v0  ;;  %v3498_v56 = vsub.f32 %v3446_v33, %v3856_v57  ;;  %v1375_v57 = vand.u32 4294901760, %v1374_v49  ;;  %v1381_v50 = vsub.f32 %v3469_v52, %v3858_v21  ;;  %v3867_v43 = vpack.c.bf16 %v3235_v27, %v3233_v26 }
 0x158   :  { %2696 = vmatpush3.bf16.msra.mxu1 %v2695_v39  ;;  %3866 = vst [vmem:[#allocation5_spill] sm:$0xff] %v3479_v12  ;;  %v3492_v39 = vld [vmem:[%s3824_s5 + $0x68] sm:$0xff]  ;;  %v3859_v17 = vand.u32 4294901760, %v3479_v12  ;;  %v3505_v51 = vsub.f32 %v3454_v11, %v3857_v1 }
 0x159   :  { %2697 = vmatprep.subr.bf16.mxu1 %v2990_v0  ;;  %v3861_v9 = vand.u32 4294901760, %v3492_v39  ;;  %v3865_v32 = vand.u32 4294901760, %v3498_v56  ;;  %v1382_v21 = vand.u32 4294901760, %v1381_v50 }
 0x15a   :  { %2810 = vmatpush3.bf16.msra.mxu0 %v2809_v46  ;;  %v1388_v1 = vsub.f32 %v3479_v12, %v3859_v17  ;;  %v3864_v42 = vand.u32 4294901760, %v3505_v51  ;;  %v2815_v46 = vpack.c.bf16 %v1375_v57, %v1368_v47  ;;  %v3868_v47 = vpack.c.bf16 %v3240_v30, %v3238_v29 }
 0x15b   :  { %2811 = vmatprep.subr.bf16.mxu0 %v2990_v0  ;;  %v3529_v49 = vsub.f32 %v3492_v39, %v3861_v9 }
 0x15c   :  { %2699 = vmatpush3.bf16.msra.mxu1 %v2698_v40  ;;  %v3524_v40 = vsub.f32 %v3487_v62, %v3860_v3  ;;  %v1389_v17 = vand.u32 4294901760, %v1388_v1  ;;  %v1395_v3 = vsub.f32 %v3498_v56, %v3865_v32  ;;  %v1402_v9 = vsub.f32 %v3505_v51, %v3864_v42 }
 0x15d   :  { %2700 = vmatprep.subr.bf16.mxu1 %v2990_v0  ;;  %v3869_v32 = vpack.c.bf16 %v3249_v38, %v3247_v37 }
 0x15e   :  { %2813 = vmatpush3.bf16.msra.mxu0 %v2812_v55  ;;  %v1408_v12 = vand.u32 4294901760, %v3524_v40  ;;  %v2818_v57 = vpack.c.bf16 %v1389_v17, %v1382_v21  ;;  %v1396_v1 = vand.u32 4294901760, %v1395_v3  ;;  %v1403_v55 = vand.u32 4294901760, %v1402_v9 }
 0x15f   :  { %2814 = vmatprep.subr.bf16.mxu0 %v2990_v0  ;;  %v3870_v3 = vmov 0.0  }
 0x160   :  { %2702 = vmatpush3.bf16.msra.mxu1 %v3867_v43  ;;  %v1415_v43 = vand.u32 4294901760, %v3529_v49  ;;  %v1409_v50 = vsub.f32 %v3524_v40, %v1408_v12  ;;  %v2821_v17 = vpack.c.bf16 %v1403_v55, %v1396_v1  ;;  %v3874_v1 = vand.u32 4294901760, %v3129_v54 }
 0x161   :  { %2703 = vmatprep.subr.bf16.mxu1 %v2990_v0  ;;  %v3875_v55 = vand.u32 4294901760, %v3137_v58  ;;  %v3879_v54 = vand.u32 4294901760, %v3152_v5  ;;  %v3885_v5 = vand.u32 4294901760, %v3240_v30  ;;  %v3888_v30 = vand.u32 4294901760, %v3431_v48 }
 0x162   :  { %2816 = vmatpush3.bf16.msra.mxu0 %v2815_v46  ;;  %v1416_v42 = vsub.f32 %v3529_v49, %v1415_v43  ;;  %v1410_v21 = vand.u32 4294901760, %v1409_v50  ;;  %v3892_v48 = vand.u32 4294901760, %v3487_v62 }
 0x163   :  { %2817 = vmatprep.subr.bf16.mxu0 %v2990_v0  ;;  %v2737_v50 = vpack.c.bf16 %v3875_v55, %v3874_v1  ;;  %v3890_v1 = vand.u32 4294901760, %v3446_v33  ;;  %v3891_v55 = vand.u32 4294901760, %v3454_v11 }
 0x164   :  { %2705 = vmatpush3.bf16.msra.mxu1 %v3868_v47  ;;  %v1417_v9 = vand.u32 4294901760, %v1416_v42  ;;  %v3871_v42 = vand.u32 4294901760, %v3105_v36  ;;  %v3876_v36 = vand.u32 4294901760, %v3139_v59  ;;  %v3882_v59 = vand.u32 4294901760, %v3233_v26 }
 0x165   :  { %2706 = vmatprep.subr.bf16.mxu1 %v2990_v0 }
 0x166   :  { %2819 = vmatpush3.bf16.msra.mxu0 %v2818_v57  ;;  %v2824_v46 = vpack.c.bf16 %v1417_v9, %v1410_v21  ;;  %v3873_v57 = vand.u32 4294901760, %v3339_v2  ;;  %v3880_v21 = vand.u32 4294901760, %v3154_v6  ;;  %v3881_v9 = vand.u32 4294901760, %v3156_v7 }
 0x167   :  { %2820 = vmatprep.subr.bf16.mxu0 %v2990_v0  ;;  %v3886_v6 = vand.u32 4294901760, %v3247_v37  ;;  %v3887_v7 = vand.u32 4294901760, %v3249_v38 }
 0x168   :  { %2708 = vmatpush3.bf16.msra.mxu1 %v3869_v32  ;;  %v3872_v32 = vand.u32 4294901760, %v3114_v41  ;;  %v3877_v41 = vand.u32 4294901760, %v3141_v60  ;;  %v3883_v60 = vand.u32 4294901760, %v3235_v27 }
 0x169   :  { %2709 = vmatprep.subr.bf16.mxu1 %v2990_v0 }
 0x16a   :  { %2822 = vmatpush3.bf16.msra.mxu0 %v2821_v17  ;;  %v2734_v47 = vpack.c.bf16 %v3872_v32, %v3871_v42  ;;  %v2740_v17 = vpack.c.bf16 %v3877_v41, %v3876_v36  ;;  %v2749_v42 = vpack.c.bf16 %v3883_v60, %v3882_v59  ;;  %v1879_v41 = vld [vmem:[%s3823_s4] ss:$0 sm:$0xff]  ;;  %v2836_v60 = vpack.c.bf16 %v3396_v4, %v3394_v15 }
 0x16b   :  { %2284 = vmatmul.mubr.f32.vlgmr.msra.gmra.mrb[0].mxu1 %v3339_v2  ;;  %2823 = vmatprep.subr.bf16.mxu0 %v2990_v0  ;;  %v3878_v2 = vand.u32 4294901760, %v3146_v63  ;;  %v3884_v63 = vand.u32 4294901760, %v3238_v29 }
 0x16c   :  { %2711 = vmatpush3.bf16.msra.mxu1 %v3083_v28  ;;  %2318 = vmatprep.mubr.msk.f32.mxu1 %vm2991_vm0, %v3870_v3 }
 0x16d   :  { %2712 = vmatprep.subr.bf16.mxu1 %v2990_v0  ;;  %v2743_v58 = vpack.c.bf16 %v3879_v54, %v3878_v2  ;;  %v2752_v32 = vpack.c.bf16 %v3885_v5, %v3884_v63  ;;  %v2830_v54 = vpack.c.bf16 %v3386_v14, %v3384_v13  ;;  %v2839_v63 = vpack.c.bf16 %v3416_v44, %v3405_v45  ;;  %v3894_v5 = vld [vmem:[#allocation5_spill] sm:$0xff] }
 0x16e   :  { %2825 = vmatpush3.bf16.msra.mxu0 %v2824_v46  ;;  %v2746_v46 = vpack.c.bf16 %v3881_v9, %v3880_v21  ;;  %v2833_v9 = vpack.c.bf16 %v3392_v16, %v3388_v25 }
 0x16f   :  { %2826 = vmatprep.subr.bf16.mxu0 %v2990_v0 }
 0x170   :  { %2714 = vmatpush3.bf16.msra.mxu1 %v3127_v53 }
 0x171   :  { %2715 = vmatprep.subr.bf16.mxu1 %v2990_v0 }
 0x174   :  { %2717 = vmatpush3.bf16.msra.mxu1 %v3144_v61 }
 0x175   :  { %2718 = vmatprep.subr.bf16.mxu1 %v2990_v0 }
 0x178   :  { %2720 = vmatpush3.bf16.msra.mxu1 %v3159_v8 }
 0x179   :  { %2721 = vmatprep.subr.bf16.mxu1 %v2990_v0 }
 0x17c   :  { %2723 = vmatpush3.bf16.msra.mxu1 %v3167_v10 }
 0x17d   :  { %2724 = vmatprep.subr.bf16.mxu1 %v2990_v0 }
 0x180   :  { %2726 = vmatpush3.bf16.msra.mxu1 %v3215_v18 }
 0x181   :  { %2727 = vmatprep.subr.bf16.mxu1 %v2990_v0 }
 0x184   :  { %2729 = vmatpush3.bf16.msra.mxu1 %v3225_v23 }
 0x185   :  { %2730 = vmatprep.subr.bf16.mxu1 %v2990_v0 }
 0x188   :  { %2732 = vmatpush3.bf16.msra.mxu1 %v3245_v35 }
 0x189   :  { %2733 = vmatprep.subr.bf16.mxu1 %v2990_v0 }
 0x18b   :  { %2319 = vmatmul.mubr.f32.vlgmr.msra.gmra.mrb[0].mxu1 %v3873_v57 }
 0x18c   :  { %2735 = vmatpush3.bf16.msra.mxu1 %v2734_v47  ;;  %2353 = vmatprep.mubr.msk.f32.mxu1 %vm2991_vm0, %v3870_v3  ;;  %v2755_v47 = vpack.c.bf16 %v3887_v7, %v3886_v6  ;;  %v2845_v6 = vpack.c.bf16 %v3505_v51, %v3498_v56  ;;  %v2848_v7 = vpack.c.bf16 %v3529_v49, %v3524_v40 }
 0x18d   :  { %2736 = vmatprep.subr.bf16.mxu1 %v2990_v0 }
 0x190   :  { %2738 = vmatpush3.bf16.msra.mxu1 %v2737_v50  ;;  %v3685_v50 = vpack.c.bf16 %v3891_v55, %v3890_v1 }
 0x191   :  { %2739 = vmatprep.subr.bf16.mxu1 %v2990_v0 }
 0x194   :  { %2741 = vmatpush3.bf16.msra.mxu1 %v2740_v17 }
 0x195   :  { %2742 = vmatprep.subr.bf16.mxu1 %v2990_v0 }
 0x198   :  { %2744 = vmatpush3.bf16.msra.mxu1 %v2743_v58 }
 0x199   :  { %2745 = vmatprep.subr.bf16.mxu1 %v2990_v0 }
 0x19c   :  { %2747 = vmatpush3.bf16.msra.mxu1 %v2746_v46 }
 0x19d   :  { %2748 = vmatprep.subr.bf16.mxu1 %v2990_v0 }
 0x1a0   :  { %2750 = vmatpush3.bf16.msra.mxu1 %v2749_v42 }
 0x1a1   :  { %2751 = vmatprep.subr.bf16.mxu1 %v2990_v0 }
 0x1a4   :  { %2753 = vmatpush3.bf16.msra.mxu1 %v2752_v32  ;;  %v2842_v32 = vpack.c.bf16 %v3894_v5, %v3469_v52 }
 0x1a5   :  { %2754 = vmatprep.subr.bf16.mxu1 %v2990_v0 }
 0x1a8   :  { %2756 = vmatpush3.bf16.msra.mxu1 %v2755_v47  ;;  %v3895_v47 = vand.u32 4294901760, %v3384_v13  ;;  %v3899_v13 = vand.u32 4294901760, %v3394_v15  ;;  %v3906_v15 = vand.u32 4294901760, %v3505_v51 }
 0x1a9   :  { %2757 = vmatprep.subr.bf16.mxu1 %v2990_v0 }
 0x1ab   :  { %2354 = vmatmul.mubr.f32.vlgmr.msra.gmra.mrb[0].mxu1 %v3336_v19 }
 0x1ac   :  { %2759 = vmatpush3.bf16.msra.mxu1 %v3083_v28  ;;  %2388 = vmatprep.mubr.msk.f32.mxu1 %vm2991_vm0, %v3870_v3  ;;  %v1221_v28 = vld [vmem:[%s3824_s5 + $0x70] sm:$0xff] }
 0x1ad   :  { %2760 = vmatprep.subr.bf16.mxu1 %v2990_v0 }
 0x1b0   :  { %2762 = vmatpush3.bf16.msra.mxu1 %v3127_v53  ;;  %v1222_v53 = vld [vmem:[%s3824_s5 + $0x78] sm:$0xff] }
 0x1b1   :  { %2763 = vmatprep.subr.bf16.mxu1 %v2990_v0 }
 0x1b4   :  { %2765 = vmatpush3.bf16.msra.mxu1 %v3144_v61  ;;  %v1273_v61 = vand.u32 4294901760, %v1221_v28 }
 0x1b5   :  { %2766 = vmatprep.subr.bf16.mxu1 %v2990_v0 }
 0x1b8   :  { %2768 = vmatpush3.bf16.msra.mxu1 %v3159_v8  ;;  %v1276_v8 = vand.u32 4294901760, %v1222_v53 }
 0x1b9   :  { %2769 = vmatprep.subr.bf16.mxu1 %v2990_v0 }
 0x1ba   :  { %v3698_v33 = vpack.c.bf16 %v1276_v8, %v1273_v61 }
 0x1bc   :  { %2771 = vmatpush3.bf16.msra.mxu1 %v3167_v10  ;;  %v3661_v10 = vsub.f32 %v1221_v28, %v1273_v61  ;;  %v3896_v28 = vand.u32 4294901760, %v3386_v14  ;;  %v3897_v61 = vand.u32 4294901760, %v3388_v25  ;;  %v3900_v14 = vand.u32 4294901760, %v3396_v4 }
 0x1bd   :  { %2772 = vmatprep.subr.bf16.mxu1 %v2990_v0  ;;  %v3902_v25 = vand.u32 4294901760, %v3416_v44  ;;  %v3905_v4 = vand.u32 4294901760, %v3498_v56  ;;  %v2896_v44 = vpack.c.bf16 %v1415_v43, %v1408_v12 }
 0x1c0   :  { %2774 = vmatpush3.bf16.msra.mxu1 %v3215_v18  ;;  %v3663_v18 = vsub.f32 %v1222_v53, %v1276_v8  ;;  %v2878_v53 = vpack.c.bf16 %v3896_v28, %v3895_v47  ;;  %v3898_v8 = vand.u32 4294901760, %v3392_v16 }
 0x1c1   :  { %2775 = vmatprep.subr.bf16.mxu1 %v2990_v0 }
 0x1c2   :  { %v1429_v26 = vand.u32 4294901760, %v3663_v18  ;;  %v2851_v11 = vpack.c.bf16 %v3663_v18, %v3661_v10 }
 0x1c4   :  { %2777 = vmatpush3.bf16.msra.mxu1 %v3225_v23  ;;  %v1422_v23 = vand.u32 4294901760, %v3661_v10  ;;  %v1430_v29 = vsub.f32 %v3663_v18, %v1429_v26 }
 0x1c5   :  { %2778 = vmatprep.subr.bf16.mxu1 %v2990_v0 }
 0x1c6   :  { %v1423_v27 = vsub.f32 %v3661_v10, %v1422_v23 }
 0x1c8   :  { %2780 = vmatpush3.bf16.msra.mxu1 %v3245_v35  ;;  %v3889_v35 = vand.u32 4294901760, %v3440_v31  ;;  %v1424_v38 = vand.u32 4294901760, %v1423_v27  ;;  %v3893_v31 = vand.u32 4294901760, %v3492_v39  ;;  %v2881_v27 = vpack.c.bf16 %v3898_v8, %v3897_v61 }
 0x1c9   :  { %2781 = vmatprep.subr.bf16.mxu1 %v2990_v0 }
 0x1ca   :  { %v3677_v37 = vpack.c.bf16 %v3889_v35, %v3888_v30  ;;  %v3694_v36 = vpack.c.bf16 %v3893_v31, %v3892_v48  ;;  %v3901_v30 = vand.u32 4294901760, %v3405_v45  ;;  %v3903_v35 = vand.u32 4294901760, %v3469_v52 }
 0x1cb   :  { %2389 = vmatmul.mubr.f32.vlgmr.msra.gmra.mrb[0].mxu1 %v3336_v19  ;;  %v1431_v19 = vand.u32 4294901760, %v1430_v29  ;;  %v2884_v29 = vpack.c.bf16 %v3900_v14, %v3899_v13  ;;  %v2899_v45 = vpack.c.bf16 %v1429_v26, %v1422_v23 }
 0x1cc   :  { %2783 = vmatpush3.bf16.msra.mxu1 %v3390_v24  ;;  %2423 = vmatprep.mubr.msk.f32.mxu1 %vm2991_vm0, %v3870_v3  ;;  %v2887_v16 = vpack.c.bf16 %v3902_v25, %v3901_v30 }
 0x1cd   :  { %2784 = vmatprep.subr.bf16.mxu1 %v2990_v0  ;;  %v2827_v57 = vpack.c.bf16 %v1431_v19, %v1424_v38  ;;  %v3904_v38 = vand.u32 4294901760, %v3894_v5 }
 0x1cf   :  { %2828 = vmatpush3.bf16.msra.mxu0 %v2827_v57  ;;  %v2890_v19 = vpack.c.bf16 %v3904_v38, %v3903_v35  ;;  %v2893_v57 = vpack.c.bf16 %v3906_v15, %v3905_v4 }
 0x1d0   :  { %2786 = vmatpush3.bf16.msra.mxu1 %v3448_v22  ;;  %2829 = vmatprep.subr.bf16.mxu0 %v2990_v0 }
 0x1d1   :  { %2787 = vmatprep.subr.bf16.mxu1 %v2990_v0 }
 0x1d4   :  { %2789 = vmatpush3.bf16.msra.mxu1 %v3471_v20 }
 0x1d5   :  { %2790 = vmatprep.subr.bf16.mxu1 %v2990_v0 }
 0x1d8   :  { %2792 = vmatpush3.bf16.msra.mxu1 %v3482_v34 }
 0x1d9   :  { %2793 = vmatprep.subr.bf16.mxu1 %v2990_v0 }
 0x1dc   :  { %2795 = vmatpush3.bf16.msra.mxu1 %v3677_v37 }
 0x1dd   :  { %2796 = vmatprep.subr.bf16.mxu1 %v2990_v0 }
 0x1e0   :  { %2798 = vmatpush3.bf16.msra.mxu1 %v3685_v50 }
 0x1e1   :  { %2799 = vmatprep.subr.bf16.mxu1 %v2990_v0 }
 0x1e4   :  { %2801 = vmatpush3.bf16.msra.mxu1 %v3694_v36 }
 0x1e5   :  { %2802 = vmatprep.subr.bf16.mxu1 %v2990_v0 }
 0x1e8   :  { %2804 = vmatpush3.bf16.msra.mxu1 %v3698_v33 }
 0x29e   :  { %v1202_v62 = vpop.f32.mrb[0].mxu1 }
 0x29f   :  { %v2926_v17 = vadd.f32 %v1879_v41, %v1202_v62  ;;  %v2390_v39 = vpop.f32.mrb[1].mxu1 }
 0x2a1   :  { %v1206_v2 = vmax.f32 %v2926_v17, 0.0 }
 0x2a3   :  { %v3708_v58 = vand.u32 4294901760, %v1206_v2 }
 0x2a5   :  { %v1312_v21 = vsub.f32 %v1206_v2, %v3708_v58  ;;  %2459 = vmatmul.mubr.f32.vlgmr.msra.gmra.mrb[2].mxu0 %v3708_v58 }
 0x2a6   :  { %2831 = vmatpush3.bf16.msra.mxu0 %v2830_v54  ;;  %2493 = vmatprep.mubr.msk.f32.mxu0 %vm2991_vm0, %v3870_v3 }
 0x2a7   :  { %v1313_v46 = vand.u32 4294901760, %v1312_v21  ;;  %2832 = vmatprep.subr.bf16.mxu0 %v2990_v0 }
 0x2a9   :  { %v1314_v59 = vsub.f32 %v1312_v21, %v1313_v46 }
 0x2aa   :  { %2834 = vmatpush3.bf16.msra.mxu0 %v2833_v9 }
 0x2ab   :  { %2835 = vmatprep.subr.bf16.mxu0 %v2990_v0  ;;  %v1315_v42 = vand.u32 4294901760, %v1314_v59 }
 0x2ad   :  { %2424 = vmatmul.mubr.f32.vlgmr.msra.gmra.mrb[2].mxu1 %v1315_v42 }
 0x2ae   :  { %2837 = vmatpush3.bf16.msra.mxu0 %v2836_v60 }
 0x2af   :  { %2838 = vmatprep.subr.bf16.mxu0 %v2990_v0 }
 0x2b2   :  { %2840 = vmatpush3.bf16.msra.mxu0 %v2839_v63 }
 0x2b3   :  { %2841 = vmatprep.subr.bf16.mxu0 %v2990_v0 }
 0x2b6   :  { %2843 = vmatpush3.bf16.msra.mxu0 %v2842_v32 }
 0x2b7   :  { %2844 = vmatprep.subr.bf16.mxu0 %v2990_v0 }
 0x2ba   :  { %2846 = vmatpush3.bf16.msra.mxu0 %v2845_v6 }
 0x2bb   :  { %2847 = vmatprep.subr.bf16.mxu0 %v2990_v0 }
 0x2be   :  { %2849 = vmatpush3.bf16.msra.mxu0 %v2848_v7 }
 0x2bf   :  { %2850 = vmatprep.subr.bf16.mxu0 %v2990_v0 }
 0x2c2   :  { %2852 = vmatpush3.bf16.msra.mxu0 %v2851_v11 }
 0x2c3   :  { %2853 = vmatprep.subr.bf16.mxu0 %v2990_v0 }
 0x2c5   :  { %2494 = vmatmul.mubr.f32.vlgmr.msra.gmra.mrb[2].mxu0 %v1312_v21 }
 0x2c6   :  { %2855 = vmatpush3.bf16.msra.mxu0 %v3390_v24  ;;  %2528 = vmatprep.mubr.msk.f32.mxu0 %vm2991_vm0, %v3870_v3 }
 0x2c7   :  { %2856 = vmatprep.subr.bf16.mxu0 %v2990_v0 }
 0x2ca   :  { %2858 = vmatpush3.bf16.msra.mxu0 %v3448_v22 }
 0x2cb   :  { %2859 = vmatprep.subr.bf16.mxu0 %v2990_v0 }
 0x2ce   :  { %2861 = vmatpush3.bf16.msra.mxu0 %v3471_v20 }
 0x2cf   :  { %2862 = vmatprep.subr.bf16.mxu0 %v2990_v0 }
 0x2d2   :  { %2864 = vmatpush3.bf16.msra.mxu0 %v3482_v34 }
 0x2d3   :  { %2865 = vmatprep.subr.bf16.mxu0 %v2990_v0 }
 0x2d6   :  { %2867 = vmatpush3.bf16.msra.mxu0 %v3677_v37 }
 0x2d7   :  { %2868 = vmatprep.subr.bf16.mxu0 %v2990_v0 }
 0x2da   :  { %2870 = vmatpush3.bf16.msra.mxu0 %v3685_v50 }
 0x2db   :  { %2871 = vmatprep.subr.bf16.mxu0 %v2990_v0 }
 0x2de   :  { %2873 = vmatpush3.bf16.msra.mxu0 %v3694_v36 }
 0x2df   :  { %2874 = vmatprep.subr.bf16.mxu0 %v2990_v0 }
 0x2e2   :  { %2876 = vmatpush3.bf16.msra.mxu0 %v3698_v33 }
 0x2e3   :  { %2877 = vmatprep.subr.bf16.mxu0 %v2990_v0 }
 0x2e5   :  { %2529 = vmatmul.mubr.f32.vlgmr.msra.gmra.mrb[2].mxu0 %v1313_v46 }
 0x2e6   :  { %2879 = vmatpush3.bf16.msra.mxu0 %v2878_v53  ;;  %2563 = vmatprep.mubr.msk.f32.mxu0 %vm2991_vm0, %v3870_v3 }
 0x2e7   :  { %2880 = vmatprep.subr.bf16.mxu0 %v2990_v0 }
 0x2ea   :  { %2882 = vmatpush3.bf16.msra.mxu0 %v2881_v27 }
 0x2eb   :  { %2883 = vmatprep.subr.bf16.mxu0 %v2990_v0 }
 0x2ee   :  { %2885 = vmatpush3.bf16.msra.mxu0 %v2884_v29 }
 0x2ef   :  { %2886 = vmatprep.subr.bf16.mxu0 %v2990_v0 }
 0x2f2   :  { %2888 = vmatpush3.bf16.msra.mxu0 %v2887_v16 }
 0x2f3   :  { %2889 = vmatprep.subr.bf16.mxu0 %v2990_v0 }
 0x2f6   :  { %2891 = vmatpush3.bf16.msra.mxu0 %v2890_v19 }
 0x2f7   :  { %2892 = vmatprep.subr.bf16.mxu0 %v2990_v0 }
 0x2fa   :  { %2894 = vmatpush3.bf16.msra.mxu0 %v2893_v57 }
 0x2fb   :  { %2895 = vmatprep.subr.bf16.mxu0 %v2990_v0 }
 0x2fe   :  { %2897 = vmatpush3.bf16.msra.mxu0 %v2896_v44 }
 0x2ff   :  { %2898 = vmatprep.subr.bf16.mxu0 %v2990_v0 }
 0x302   :  { %2900 = vmatpush3.bf16.msra.mxu0 %v2899_v45 }
 0x303   :  { %2901 = vmatprep.subr.bf16.mxu0 %v2990_v0 }
 0x305   :  { %2564 = vmatmul.mubr.f32.vlgmr.msra.gmra.mrb[2].mxu0 %v3708_v58 }
 0x306   :  { %2903 = vmatpush3.bf16.msra.mxu0 %v3390_v24  ;;  %2598 = vmatprep.mubr.msk.f32.mxu0 %vm2991_vm0, %v3870_v3 }
 0x307   :  { %2904 = vmatprep.subr.bf16.mxu0 %v2990_v0 }
 0x30a   :  { %2906 = vmatpush3.bf16.msra.mxu0 %v3448_v22  ;;  %v1880_v22 = vld [vmem:[%s3825_s6] ss:$0 sm:$0xff] }
 0x30b   :  { %2907 = vmatprep.subr.bf16.mxu0 %v2990_v0 }
 0x30e   :  { %2909 = vmatpush3.bf16.msra.mxu0 %v3471_v20 }
 0x30f   :  { %2910 = vmatprep.subr.bf16.mxu0 %v2990_v0 }
 0x312   :  { %2912 = vmatpush3.bf16.msra.mxu0 %v3482_v34 }
 0x313   :  { %2913 = vmatprep.subr.bf16.mxu0 %v2990_v0 }
 0x316   :  { %2915 = vmatpush3.bf16.msra.mxu0 %v3677_v37 }
 0x317   :  { %2916 = vmatprep.subr.bf16.mxu0 %v2990_v0 }
 0x31a   :  { %2918 = vmatpush3.bf16.msra.mxu0 %v3685_v50 }
 0x31b   :  { %2919 = vmatprep.subr.bf16.mxu0 %v2990_v0 }
 0x31e   :  { %2921 = vmatpush3.bf16.msra.mxu0 %v3694_v36 }
 0x31f   :  { %2922 = vmatprep.subr.bf16.mxu0 %v2990_v0 }
 0x322   :  { %2924 = vmatpush3.bf16.msra.mxu0 %v3698_v33 }
 0x325   :  { %2599 = vmatmul.mubr.f32.vlgmr.msra.gmra.mrb[2].mxu0 %v3708_v58 }
 0x380   :  { %v1317_v51 = vpop.f32.mrb[2].mxu1 }
 0x381   :  { %v2425_v24 = vpop.f32.mrb[3].mxu1  ;;  %v1318_v52 = vadd.f32 %v1880_v22, %v1317_v51 }
 0x3f8   :  { %v1867_v20 = vpop.f32.mrb[2].mxu0 }
 0x3f9   :  { %v2928_v12 = vadd.f32 %v1867_v20, %v1318_v52  ;;  %v2600_v34 = vpop.f32.mrb[3].mxu0 }
 0x3fb   :  { %1872 = vst.msk [vmem:[%s3826_s7] sm:$0xff] %vm1871_vm2, %v2928_v12 }
 0x3fc   :  { %1877 = vsyncpa [#allocation3], 1 }

</bundles_post_ra>
